<compile_context>
chip_gen: v7x
topology: tpu7x:2x2x1
jax: 0.10.0
libtpu: 0.0.40
codegen_flags: <defaults>
</compile_context>

<pallas_src>
import functools

import jax
import jax.numpy as jnp
from jax import lax
from jax.experimental import pallas as pl
from jax.experimental.pallas import tpu as pltpu

LN_EPS = 1e-12                      # HuggingFace BertLayerNorm eps (math kept in f32)
VMEM_LIMIT = 32 * 1024 * 1024       # safe on v5e / v6e / v7x


def _pick_tile(dim, target, align):
    """Largest `align`-multiple <= target that divides dim; full dim if small/awkward."""
    if dim <= target:
        return dim
    t = (target // align) * align
    while t >= align:
        if dim % t == 0:
            return t
        t -= align
    return dim


# ---------------------------------------------------------------------------
# Tiled matmul + bias (+ GELU)  —  MXU path
# ---------------------------------------------------------------------------

def _matmul_bias_kernel(x_ref, w_ref, b_ref, o_ref, acc_ref, *, act):
    @pl.when(pl.program_id(2) == 0)
    def _():
        acc_ref[...] = jnp.zeros_like(acc_ref)

    acc_ref[...] += jnp.dot(x_ref[...].astype(jnp.bfloat16),
                            w_ref[...].astype(jnp.bfloat16),
                            preferred_element_type=jnp.float32)

    @pl.when(pl.program_id(2) == pl.num_programs(2) - 1)
    def _():
        out = acc_ref[...] + b_ref[...].astype(jnp.float32)
        if act == "gelu":
            # TODO(synk): HF BERT "gelu" is erf-based; tanh approx used (TPU/EUP friendly).
            out = jax.nn.gelu(out, approximate=True)
        o_ref[...] = out.astype(o_ref.dtype)


def matmul_bias(x, w, b, act="none", out_dtype=jnp.float32):
    """y = act(x @ w + b). x:(M,K), w:(K,N) (bf16 weights ok), b:(N,) f32."""
    M, K = x.shape
    _, N = w.shape
    tm = _pick_tile(M, 256, 8)
    tn = _pick_tile(N, 512, 128)
    tk = _pick_tile(K, 512, 128)
    gm, gn, gk = M // tm, N // tn, K // tk

    cost = pl.CostEstimate(
        flops=2 * M * N * K,
        transcendentals=(M * N) if act == "gelu" else 0,
        bytes_accessed=(M * K * x.dtype.itemsize + K * N * w.dtype.itemsize
                        + M * N * jnp.dtype(out_dtype).itemsize),
    )
    return pl.pallas_call(
        functools.partial(_matmul_bias_kernel, act=act),
        grid=(gm, gn, gk),
        in_specs=[pl.BlockSpec((tm, tk), lambda i, j, k: (i, k)),
                  pl.BlockSpec((tk, tn), lambda i, j, k: (k, j)),
                  pl.BlockSpec((1, tn), lambda i, j, k: (0, j))],
        out_specs=pl.BlockSpec((tm, tn), lambda i, j, k: (i, j)),
        out_shape=jax.ShapeDtypeStruct((M, N), out_dtype),
        scratch_shapes=[pltpu.VMEM((tm, tn), jnp.float32)],
        compiler_params=pltpu.CompilerParams(
            dimension_semantics=("parallel", "parallel", "arbitrary"),
            vmem_limit_bytes=VMEM_LIMIT),
        cost_estimate=cost,
    )(x, w, b.reshape(1, N))


# ---------------------------------------------------------------------------
# LayerNorm (optionally fused with residual add), tiled over rows
# ---------------------------------------------------------------------------

def _ln_body(x, g_ref, b_ref, o_ref, eps):
    mu = jnp.mean(x, axis=-1, keepdims=True)
    xc = x - mu
    var = jnp.mean(xc * xc, axis=-1, keepdims=True)
    inv = lax.rsqrt(var + eps)
    o_ref[...] = (xc * inv * g_ref[...].astype(jnp.float32)
                  + b_ref[...].astype(jnp.float32)).astype(o_ref.dtype)


def _ln_kernel(x_ref, g_ref, b_ref, o_ref, *, eps):
    _ln_body(x_ref[...].astype(jnp.float32), g_ref, b_ref, o_ref, eps)


def _ln_res_kernel(x_ref, r_ref, g_ref, b_ref, o_ref, *, eps):
    x = x_ref[...].astype(jnp.float32) + r_ref[...].astype(jnp.float32)
    _ln_body(x, g_ref, b_ref, o_ref, eps)


def layernorm(x, gamma, beta, residual=None, eps=LN_EPS):
    M, H = x.shape
    tm = _pick_tile(M, 256, 8)
    row_spec = pl.BlockSpec((tm, H), lambda i: (i, 0))
    vec_spec = pl.BlockSpec((1, H), lambda i: (0, 0))
    if residual is None:
        kern = functools.partial(_ln_kernel, eps=eps)
        ins = (x, gamma.reshape(1, H), beta.reshape(1, H))
        in_specs = [row_spec, vec_spec, vec_spec]
    else:
        kern = functools.partial(_ln_res_kernel, eps=eps)
        ins = (x, residual, gamma.reshape(1, H), beta.reshape(1, H))
        in_specs = [row_spec, row_spec, vec_spec, vec_spec]
    return pl.pallas_call(
        kern,
        grid=(M // tm,),
        in_specs=in_specs,
        out_specs=row_spec,
        out_shape=jax.ShapeDtypeStruct((M, H), jnp.float32),
        compiler_params=pltpu.CompilerParams(
            dimension_semantics=("parallel",),
            vmem_limit_bytes=VMEM_LIMIT),
    )(*ins)


# ---------------------------------------------------------------------------
# Attention: one grid step per batch element, fused qkv input, all heads packed,
# no HBM transposes and no XLA q/k/v slice copies.
# ---------------------------------------------------------------------------

def _attention_kernel(qkv_ref, mb_ref, o_ref, *, nH, dH, H, scale):
    mb = mb_ref[0]                                   # (1, S) additive bias, f32
    ctx_heads = []
    for h in range(nH):                              # static unroll; lane slices only
        q = qkv_ref[0, :, h * dH:(h + 1) * dH]                     # (S, dH) bf16
        k = qkv_ref[0, :, H + h * dH:H + (h + 1) * dH]
        v = qkv_ref[0, :, 2 * H + h * dH:2 * H + (h + 1) * dH]
        s = lax.dot_general(q, k, (((1,), (1,)), ((), ())),
                            preferred_element_type=jnp.float32) * scale
        s = s + mb                                   # broadcast (1,S) -> (S,S)
        s = s - jnp.max(s, axis=-1, keepdims=True)
        p = jnp.exp(s)
        p = p * pl.reciprocal(jnp.sum(p, axis=-1, keepdims=True), approx=True)
        ctx_heads.append(jnp.dot(p.astype(v.dtype), v,
                                 preferred_element_type=jnp.float32))
    # single unmasked lane-dense store of all heads
    o_ref[0] = jnp.concatenate(ctx_heads, axis=-1).astype(o_ref.dtype)


def attention(qkv, attn_bias, *, nH):
    """qkv: (B, S, 3H) bf16 (q|k|v packed, heads packed); attn_bias: (B, 1, S) f32."""
    B, S, H3 = qkv.shape
    H = H3 // 3
    dH = H // nH
    scale = 1.0 / float(dH) ** 0.5
    cost = pl.CostEstimate(
        flops=4 * B * nH * S * S * dH,
        transcendentals=B * nH * S * S,
        bytes_accessed=(B * S * 3 * H * 2 + B * S * H * 2 + B * S * 4),
    )
    return pl.pallas_call(
        functools.partial(_attention_kernel, nH=nH, dH=dH, H=H, scale=scale),
        grid=(B,),
        in_specs=[pl.BlockSpec((1, S, 3 * H), lambda b: (b, 0, 0)),
                  pl.BlockSpec((1, 1, S), lambda b: (b, 0, 0))],
        out_specs=pl.BlockSpec((1, S, H), lambda b: (b, 0, 0)),
        out_shape=jax.ShapeDtypeStruct((B, S, H), jnp.bfloat16),
        compiler_params=pltpu.CompilerParams(
            dimension_semantics=("parallel",),
            vmem_limit_bytes=VMEM_LIMIT),
        cost_estimate=cost,
    )(qkv, attn_bias)


# ---------------------------------------------------------------------------
# BERT model built from the Pallas kernels
# ---------------------------------------------------------------------------

def init_params(key, vocab, H, I, L, max_pos):
    std = 0.02
    wdt = jnp.bfloat16               # matmul weights stored bf16; biases / LN params f32
    k_emb, k_pos, k_typ, k_layers = jax.random.split(key, 4)
    params = {
        "word_emb": std * jax.random.normal(k_emb, (vocab, H), jnp.float32),
        "pos_emb":  std * jax.random.normal(k_pos, (max_pos, H), jnp.float32),
        "type_emb": std * jax.random.normal(k_typ, (2, H), jnp.float32),
        "emb_ln_g": jnp.ones((H,), jnp.float32),
        "emb_ln_b": jnp.zeros((H,), jnp.float32),
        "layers": [],
    }
    layer_keys = jax.random.split(k_layers, L)
    for lk in layer_keys:
        ks = jax.random.split(lk, 4)
        layer = {
            # fused Q/K/V projection
            "qkv_w": (std * jax.random.normal(ks[0], (H, 3 * H), jnp.float32)).astype(wdt),
            "qkv_b": jnp.zeros((3 * H,), jnp.float32),
            "o_w": (std * jax.random.normal(ks[1], (H, H), jnp.float32)).astype(wdt),
            "o_b": jnp.zeros((H,), jnp.float32),
            "ln1_g": jnp.ones((H,), jnp.float32), "ln1_b": jnp.zeros((H,), jnp.float32),
            "fc1_w": (std * jax.random.normal(ks[2], (H, I), jnp.float32)).astype(wdt),
            "fc1_b": jnp.zeros((I,), jnp.float32),
            "fc2_w": (std * jax.random.normal(ks[3], (I, H), jnp.float32)).astype(wdt),
            "fc2_b": jnp.zeros((H,), jnp.float32),
            "ln2_g": jnp.ones((H,), jnp.float32), "ln2_b": jnp.zeros((H,), jnp.float32),
        }
        params["layers"].append(layer)
    return params


def bert_layer(x2, lp, attn_bias, B, S, nH):
    """x2: (B*S, H) f32 residual stream."""
    H = x2.shape[1]

    # fused Q/K/V projection: one matmul, bf16 output consumed directly by attention
    qkv = matmul_bias(x2, lp["qkv_w"], lp["qkv_b"],
                      out_dtype=jnp.bfloat16).reshape(B, S, 3 * H)

    ctx = attention(qkv, attn_bias, nH=nH).reshape(B * S, H)          # bf16
    attn_out = matmul_bias(ctx, lp["o_w"], lp["o_b"])                 # f32
    x2 = layernorm(attn_out, lp["ln1_g"], lp["ln1_b"], residual=x2)   # fused add+LN

    ff = matmul_bias(x2, lp["fc1_w"], lp["fc1_b"], act="gelu",
                     out_dtype=jnp.bfloat16)
    ff = matmul_bias(ff, lp["fc2_w"], lp["fc2_b"])                    # f32
    x2 = layernorm(ff, lp["ln2_g"], lp["ln2_b"], residual=x2)         # fused add+LN
    return x2


def bert_forward(params, token_ids, attn_mask, *, enc_num, nH):
    """Mirrors BERT.forward: returns (hidden_states, inverted_bool_mask)."""
    B, S = token_ids.shape
    H = params["word_emb"].shape[1]

    # embedding gather is glue (lookup); normalization/compute are Pallas
    word = jnp.take(params["word_emb"], token_ids, axis=0)            # (B, S, H)

    if enc_num > 0:
        pos = params["pos_emb"][:S][None, :, :]                       # (1, S, H)
        typ = params["type_emb"][0][None, None, :]                    # token_type_ids=None
        emb = (word + pos + typ).reshape(B * S, H)
        x2 = layernorm(emb, params["emb_ln_g"], params["emb_ln_b"])
        # HF extended attention mask: (1 - mask) * -10000 added to scores
        attn_bias = ((1.0 - attn_mask.astype(jnp.float32)) * -10000.0
                     ).reshape(B, 1, S)
        for lp in params["layers"]:
            x2 = bert_layer(x2, lp, attn_bias, B, S, nH)
        xs = x2.reshape(B, S, H)
    else:
        xs = word  # self.bert.embeddings.word_embeddings(text_data_tensors)

    inv_mask = jnp.logical_not(attn_mask.astype(jnp.bool_))           # mask = ~mask
    return xs, inv_mask  # NestedTensor(xs, mask)


# ---------------------------------------------------------------------------
# Main
# ---------------------------------------------------------------------------

if __name__ == "__main__":
    # small synthetic config (real BERT: H=768/1024, 12 heads, 12 layers)
    B, S = 2, 8
    H, nH, I = 32, 4, 64
    VOCAB, MAX_POS = 100, 32
    ENC_NUM = 2                   # > 0 -> full encoder path with ENC_NUM layers
    assert H % nH == 0

    key = jax.random.PRNGKey(0)
    k_param, k_tok = jax.random.split(key)

    params = init_params(k_param, VOCAB, H, I, ENC_NUM, MAX_POS)

    token_ids = jax.random.randint(k_tok, (B, S), 0, VOCAB, dtype=jnp.int32)
    # attention mask: row 0 fully valid, row 1 has 3 padded tokens
    attn_mask = jnp.array([[1, 1, 1, 1, 1, 1, 1, 1],
                           [1, 1, 1, 1, 1, 0, 0, 0]], dtype=jnp.int32)

    xs, inv_mask = bert_forward(params, token_ids, attn_mask,
                                enc_num=ENC_NUM, nH=nH)
    xs = jax.block_until_ready(xs)
    inv_mask = jax.block_until_ready(inv_mask)

    assert xs.shape == (B, S, H) and xs.dtype == jnp.float32
    assert inv_mask.shape == (B, S) and inv_mask.dtype == jnp.bool_
    assert bool(jnp.all(jnp.isfinite(xs)))

    print("KERNEL_OK")
</pallas_src>

<mosaic_0001>
module attributes {stable_mosaic.version = 11 : i64} {
  func.func @_ln_kernel(%arg0: i32, %arg1: memref<16x32xf32, #tpu.memory_space<vmem>>, %arg2: memref<1x32xf32, #tpu.memory_space<vmem>>, %arg3: memref<1x32xf32, #tpu.memory_space<vmem>>, %arg4: memref<16x32xf32, #tpu.memory_space<vmem>>) attributes {dimension_semantics = [#tpu.dimension_semantics<parallel>], iteration_bounds = array<i64: 1>, scalar_prefetch = 0 : i64, scratch_operands = 0 : i64, tpu.core_type = #tpu.core_type<tc>, window_params = [{transform_indices = @transform_0, window_bounds = array<i64: 16, 32>}, {pipeline_mode = #tpu.pipeline_mode<synchronous>, transform_indices = @transform_1, window_bounds = array<i64: 1, 32>}, {pipeline_mode = #tpu.pipeline_mode<synchronous>, transform_indices = @transform_2, window_bounds = array<i64: 1, 32>}, {transform_indices = @transform_3, window_bounds = array<i64: 16, 32>}]} {
    %c0 = arith.constant 0 : index
    %c0_0 = arith.constant 0 : index
    %0 = vector.load %arg1[%c0, %c0_0] : memref<16x32xf32, #tpu.memory_space<vmem>>, vector<16x32xf32>
    %cst = arith.constant dense<0.000000e+00> : vector<16xf32>
    %1 = vector.multi_reduction <add>, %0, %cst [1] : vector<16x32xf32> to vector<16xf32>
    %2 = vector.shape_cast %1 : vector<16xf32> to vector<16x1xf32>
    %cst_1 = arith.constant 3.200000e+01 : f32
    %3 = vector.broadcast %cst_1 : f32 to vector<16x1xf32>
    %4 = arith.divf %2, %3 : vector<16x1xf32>
    %5 = vector.broadcast %4 : vector<16x1xf32> to vector<16x32xf32>
    %6 = arith.subf %0, %5 : vector<16x32xf32>
    %7 = arith.mulf %6, %6 : vector<16x32xf32>
    %cst_2 = arith.constant dense<0.000000e+00> : vector<16xf32>
    %8 = vector.multi_reduction <add>, %7, %cst_2 [1] : vector<16x32xf32> to vector<16xf32>
    %9 = vector.shape_cast %8 : vector<16xf32> to vector<16x1xf32>
    %cst_3 = arith.constant 3.200000e+01 : f32
    %10 = vector.broadcast %cst_3 : f32 to vector<16x1xf32>
    %11 = arith.divf %9, %10 : vector<16x1xf32>
    %cst_4 = arith.constant 9.99999996E-13 : f32
    %12 = vector.broadcast %cst_4 : f32 to vector<16x1xf32>
    %13 = arith.addf %11, %12 : vector<16x1xf32>
    %14 = math.rsqrt %13 : vector<16x1xf32>
    %15 = vector.broadcast %14 : vector<16x1xf32> to vector<16x32xf32>
    %16 = arith.mulf %6, %15 : vector<16x32xf32>
    %c0_5 = arith.constant 0 : index
    %c0_6 = arith.constant 0 : index
    %17 = vector.load %arg2[%c0_5, %c0_6] : memref<1x32xf32, #tpu.memory_space<vmem>>, vector<1x32xf32>
    %18 = vector.broadcast %17 : vector<1x32xf32> to vector<16x32xf32>
    %19 = arith.mulf %16, %18 : vector<16x32xf32>
    %c0_7 = arith.constant 0 : index
    %c0_8 = arith.constant 0 : index
    %20 = vector.load %arg3[%c0_7, %c0_8] : memref<1x32xf32, #tpu.memory_space<vmem>>, vector<1x32xf32>
    %21 = vector.broadcast %20 : vector<1x32xf32> to vector<16x32xf32>
    %22 = arith.addf %19, %21 : vector<16x32xf32>
    %c0_9 = arith.constant 0 : index
    %c0_10 = arith.constant 0 : index
    %23 = vector.load %arg4[%c0_9, %c0_10] : memref<16x32xf32, #tpu.memory_space<vmem>>, vector<16x32xf32>
    tpu.vector_store %arg4[%c0_9, %c0_10], %22 {strides = array<i32>} : memref<16x32xf32, #tpu.memory_space<vmem>>, vector<16x32xf32>,
    return
  }
  func.func @transform_0(%arg0: i32) -> (i32, i32) {
    %c0_i32 = arith.constant 0 : i32
    %c0_i32_0 = arith.constant 0 : i32
    return %arg0, %c0_i32 : i32, i32
  }
  func.func @transform_1(%arg0: i32) -> (i32, i32) {
    %c0_i32 = arith.constant 0 : i32
    %c0_i32_0 = arith.constant 0 : i32
    %c0_i32_1 = arith.constant 0 : i32
    return %c0_i32, %c0_i32_0 : i32, i32
  }
  func.func @transform_2(%arg0: i32) -> (i32, i32) {
    %c0_i32 = arith.constant 0 : i32
    %c0_i32_0 = arith.constant 0 : i32
    %c0_i32_1 = arith.constant 0 : i32
    return %c0_i32, %c0_i32_0 : i32, i32
  }
  func.func @transform_3(%arg0: i32) -> (i32, i32) {
    %c0_i32 = arith.constant 0 : i32
    %c0_i32_0 = arith.constant 0 : i32
    return %arg0, %c0_i32 : i32, i32
  }
}

</mosaic_0001>

<bundles_post_ra>
// kernel: tpu_custom_call.1
= control target key start
LH: loop header
LB: loop body
LE: loop exit
PB: predicated region body
PF: predicated region fallthrough
CT: control target
= control target key end

     0   :  { %8 = vsyncpa [#allocation3], 0  ;;  %s220_s0 = inlined_call_operand.hbm [shape: f32[16,32], index: 0, kind: input, shape index: {}]   ;;  %s221_s1 = inlined_call_operand.vmem [shape: f32[1,32], index: 1, kind: input, shape index: {}]   ;;  %s222_s2 = inlined_call_operand.vmem [shape: f32[1,32], index: 2, kind: input, shape index: {}]   ;;  %s223_s3 = inlined_call_operand.hbm [shape: f32[16,32], index: 3, kind: output, shape index: {}]  }
   0x1   :  { %9 = vsyncpa [#allocation4], 0  ;;  %s154_s12 = smov [#allocation2]   ;;  %s106_s16 = scalar_lea.hbm %s220_s0, 256 }
   0x2   :  { %s15_s13 = sshll.u32 %s154_s12, 4  ;;  %p107_p0 = scmp.ne.s32.totalorder %s220_s0, %s106_s16  ;;  %s16_s13 = int_to_ptr.vmem [resolvable:$true] %s15_s13 }
   0x3   :  { %p110_p1 = scmp.lt.u32.totalorder %s106_s16, %s220_s0 }
   0x5   :  { %p112_p2 = pnand %p110_p1, %p107_p0 }
   0x7   :  { %115 = shalt.err (!%p112_p2)
}
   0x8   :  { %s116_s21 = scalar_lea.vmem %s16_s13, 256  ;;  %p121_p4 = scmp.lt.s32.totalorder %s16_s13, %s16_s13 }
   0x9   :  { %p117_p3 = scmp.ne.s32.totalorder %s16_s13, %s116_s21  ;;  %p122_p5 = scmp.lt.s32.totalorder %s116_s21, %s116_s21 }
   0xb   :  { %p123_p6 = por %p122_p5, %p121_p4 }
   0xd   :  { %p124_p7 = pnand %p123_p6, %p117_p3 }
   0xf   :  { %127 = shalt.err (!%p124_p7)
}
  0x10   :  { %s155_s22 = smov 128   ;;  %s156_s23 = smov 8  }
  0x11   :  { %21 = dma.hbm_to_vmem [thread:$0]  %s220_s0, 256, %s16_s13, [#allocation3], %s155_s22, %s155_s22, %s156_s23  }
  0x12   :  { %150 = dma.done.wait [#allocation3], 256  }
  0x13   :  { %151 = vsyncadd [#allocation3], 4294967040  ;;  %vm31_vm0 = vcmask 261120   ;;  %v29_v0 = vld [vmem:[#allocation2] sm:$0xff]  ;;  %v30_v1 = vld [vmem:[#allocation2 + $0x8] sm:$0xff]  ;;  %s157_s29 = smov [#allocation5]  }
  0x14   :  { %v32_v2 = vsel %vm31_vm0, %v29_v0, 0.0  ;;  %v35_v3 = vsel %vm31_vm0, %v30_v1, 0.0  ;;  %v96_v21 = vld [vmem:[%s221_s1] ss:$0 sm:$0xff]  ;;  %s84_s30 = sshll.u32 %s157_s29, 4  ;;  %s85_s30 = int_to_ptr.vmem [resolvable:$true] %s84_s30 }
  0x15   :  { %33 = vadd.xlane.f32.xlu0 %v32_v2  ;;  %v97_v23 = vld [vmem:[%s222_s2] ss:$0 sm:$0xff]  ;;  %s128_s4 = scalar_lea.vmem %s85_s30, 256  ;;  %p133_p9 = scmp.lt.s32.totalorder %s85_s30, %s85_s30 }
  0x16   :  { %p129_p8 = scmp.ne.s32.totalorder %s85_s30, %s128_s4  ;;  %p134_p10 = scmp.lt.s32.totalorder %s128_s4, %s128_s4 }
  0x18   :  { %p135_p11 = por %p134_p10, %p133_p9 }
  0x19   :  { %36 = vadd.xlane.f32.xlu0 %v35_v3 }
  0x1a   :  { %p136_p12 = pnand %p135_p11, %p129_p8 }
  0xa2   :  { %v34_v4 = vpop.xlane.xlu0 %33 }
  0xa3   :  { %v39_v5 = vmul.f32 0.03125, %v34_v4 }
  0xa5   :  { %v41_v6 = vsub.f32 %v29_v0, %v39_v5 }
  0xa6   :  { %v37_v7 = vpop.xlane.xlu0 %36 }
  0xa7   :  { %v40_v8 = vmul.f32 0.03125, %v37_v7  ;;  %v43_v9 = vmul.f32 %v41_v6, %v41_v6 }
  0xa9   :  { %v42_v10 = vsub.f32 %v30_v1, %v40_v8  ;;  %v45_v11 = vsel %vm31_vm0, %v43_v9, 0.0 }
  0xaa   :  { %46 = vadd.xlane.f32.xlu1 %v45_v11 }
  0xab   :  { %v44_v12 = vmul.f32 %v42_v10, %v42_v10 }
  0xad   :  { %v48_v13 = vsel %vm31_vm0, %v44_v12, 0.0 }
  0xae   :  { %49 = vadd.xlane.f32.xlu1 %v48_v13 }
 0x137   :  { %v47_v14 = vpop.xlane.xlu1 %46 }
 0x138   :  { %v51_v15 = vmul.f32 0.03125, %v47_v14 }
 0x13a   :  { %v53_v16 = vadd.f32 1e-12, %v51_v15 }
 0x13b   :  { %v50_v17 = vpop.xlane.xlu1 %49 }
 0x13c   :  { %102 = vrsqrt.f32 %v53_v16  ;;  %v52_v18 = vmul.f32 0.03125, %v50_v17 }
 0x13e   :  { %v54_v19 = vadd.f32 1e-12, %v52_v18 }
 0x140   :  { %104 = vrsqrt.f32 %v54_v19 }
 0x146   :  { %v103_v20 = vpop.eup %102 }
 0x147   :  { %v57_v22 = vmul.f32 %v103_v20, %v41_v6 }
 0x149   :  { %v66_v24 = vmul.f32 %v96_v21, %v57_v22 }
 0x14a   :  { %v105_v25 = vpop.eup %104 }
 0x14b   :  { %v58_v26 = vmul.f32 %v105_v25, %v42_v10  ;;  %v75_v27 = vadd.f32 %v97_v23, %v66_v24 }
 0x14d   :  { %v67_v28 = vmul.f32 %v96_v21, %v58_v26  ;;  %77 = vst.msk [vmem:[#allocation5] sm:$0xff] %vm31_vm0, %v75_v27 }
 0x14f   :  { %v76_v29 = vadd.f32 %v97_v23, %v67_v28 }
 0x151   :  { %78 = vst.msk [vmem:[#allocation5 + $0x8] sm:$0xff] %vm31_vm0, %v76_v29 }
 0x152   :  { %139 = shalt.err (!%p136_p12)
}
 0x153   :  { %s140_s5 = scalar_lea.hbm %s223_s3, 256 }
 0x154   :  { %p141_p13 = scmp.ne.s32.totalorder %s223_s3, %s140_s5  ;;  %p144_p0 = scmp.lt.u32.totalorder %s140_s5, %s223_s3 }
 0x156   :  { %p146_p1 = pnand %p144_p0, %p141_p13 }
 0x158   :  { %149 = shalt.err (!%p146_p1)
}
 0x159   :  { %90 = dma.vmem_to_hbm [thread:$0]  %s85_s30, 256, %s223_s3, [#allocation4], %s155_s22, %s155_s22, %s156_s23  }
 0x15a   :  { %152 = dma.done.wait [#allocation4], 256  }
 0x15b   :  { %153 = vsyncadd [#allocation4], 4294967040 }
 0x15c   :  { %94 = vsyncpa [#allocation3], 1 }
 0x15d   :  { %95 = vsyncpa [#allocation4], 1 }

</bundles_post_ra>
